<compile_context>
chip_gen: v7x
topology: tpu7x:2x2x1
jax: 0.10.0
libtpu: 0.0.40
codegen_flags: <defaults>
</compile_context>

<pallas_src>
import jax
import jax.numpy as jnp
from jax.experimental import pallas as pl
from jax.experimental.pallas import tpu as pltpu


# ----------------------------------------------------------------------------
# tiling helpers (VMEM-budget aware; aimed at v5e's 16 MiB scoped default so
# the same tiles are safe on v6e (32 MiB scoped) and v7x (64 MiB physical)).
# ----------------------------------------------------------------------------
_VMEM_BUDGET = 8 << 20   # bytes reserved for the dominant double-buffered streams


def _round_up(x, m):
    return ((x + m - 1) // m) * m


def _largest_divisor_tile(dim, max_tile, align):
    """Largest t <= max_tile with t % align == 0 and dim % t == 0, else None."""
    t = (min(max_tile, dim) // align) * align
    while t >= align:
        if dim % t == 0:
            return t
        t -= align
    return None


def _fused_tiles(N, K, budget=_VMEM_BUDGET):
    """Pick (tn, tk, Kp) for the fused resolve+relax kernel.

    Dominant VMEM use: 2 weight matrices x 2 pipeline buffers x (tn*tk) f32
    = 16*tn*tk bytes. K is padded up to Kp (multiple of tk) wrapper-side.
    """
    if N % 128 == 0:
        tn = _largest_divisor_tile(N, 512, 128) or N
    else:
        # TODO(synk): non-128-aligned N uses a full-extent column block; pad N
        # wrapper-side if such layer widths ever get large enough to matter.
        tn = N
    max_tk = max(128, (budget // (16 * max(tn, 1))) // 128 * 128)
    Kp = _round_up(K, 128)
    tk = _largest_divisor_tile(Kp, max_tk, 128) or 128   # 128 always divides Kp
    return tn, tk, Kp


def _diag_row_tile(N, budget=_VMEM_BUDGET):
    """Row-slab height for diag expansion: 2 outs x 2 bufs x tr x N x 4 B <= budget."""
    if N % 8 != 0:
        return N                      # full-extent is the only legal layout
    cap = max(8, min(N, (budget // (16 * N)) // 8 * 8))
    t = cap
    while t >= 8:
        if N % t == 0:
            return t
        t -= 8
    return N


# ----------------------------------------------------------------------------
# shared relaxation math (operates on (1, tn) tiles)
# ----------------------------------------------------------------------------
def _relax_math(l, u):
    """DeepPoly ReLU relaxation -> (ineql_vec, biasl_vec, inequ_vec, biasu_vec)."""
    slope = u / (u - l)                            # true divide (soundness)
    slope = jnp.where(slope != slope, 0.0, slope)  # NaN (u==l==0) -> 0
    # NOTE: when u == l != 0 slope is +-inf, but such neurons are never
    # `crossing` (they are strictly above or below), so the inf only ever sits
    # in the non-selected branch of the jnp.where below. Do not reorder.
    intercept = (1.0 - slope) * u

    below = u < 0.0
    above = l > 0.0
    crossing = jnp.logical_and(jnp.logical_not(below), jnp.logical_not(above))

    one = jnp.ones_like(l)
    zero = jnp.zeros_like(l)
    ineql_vec = jnp.where(above, one, zero)             # lower: 0 or identity
    inequ_vec = jnp.where(crossing, slope, ineql_vec)   # upper: slope if crossing
    biasu_vec = jnp.where(crossing, intercept, zero)
    return ineql_vec, zero, inequ_vec, biasu_vec


# ----------------------------------------------------------------------------
# Kernel 1: fused resolve (backsub to concrete bounds) + ReLU relaxation.
# grid = (N // tn  [parallel, megacore on v7x],  Kp // tk  [arbitrary, reduction])
# Output is a single packed (8, N) array:
#   row 0 = lb, 1 = ub, 2 = ineql_vec, 3 = biasl, 4 = inequ_vec, 5 = biasu,
#   rows 6-7 = padding (one lane-dense full-sublane writeback DMA per column tile).
# ----------------------------------------------------------------------------
_DN_ABT = (((1,), (1,)), ((), ()))   # contract last dims of both operands: A @ B^T


def _dp_relu_fused_kernel(rl_ref, ru_ref, wl_ref, wu_ref, bl_ref, bu_ref,
                          out_ref, acc_l_ref, acc_u_ref):
    k = pl.program_id(1)

    @pl.when(k == 0)
    def _():
        acc_l_ref[...] = jnp.zeros_like(acc_l_ref)
        acc_u_ref[...] = jnp.zeros_like(acc_u_ref)

    rl = rl_ref[...]                       # (1, tk)
    ru = ru_ref[...]                       # (1, tk)
    s = rl + ru
    d = rl - ru
    wl = wl_ref[...]                       # (tn, tk), native (N, K) layout
    wu = wu_ref[...]                       # (tn, tk)

    # sum/diff + abs identity:
    #   2*lout_pre = s @ Wl^T + d @ |Wl|^T
    #   2*uout_pre = s @ Wu^T - d @ |Wu|^T
    acc_l_ref[...] += (
        jax.lax.dot_general(s, wl, _DN_ABT, preferred_element_type=jnp.float32)
        + jax.lax.dot_general(d, jnp.abs(wl), _DN_ABT,
                              preferred_element_type=jnp.float32))
    acc_u_ref[...] += (
        jax.lax.dot_general(s, wu, _DN_ABT, preferred_element_type=jnp.float32)
        - jax.lax.dot_general(d, jnp.abs(wu), _DN_ABT,
                              preferred_element_type=jnp.float32))

    @pl.when(k == pl.num_programs(1) - 1)
    def _():
        l = 0.5 * acc_l_ref[...] + bl_ref[...]
        u = 0.5 * acc_u_ref[...] + bu_ref[...]
        ineql_v, biasl_v, inequ_v, biasu_v = _relax_math(l, u)
        out_ref[0:1, :] = l
        out_ref[1:2, :] = u
        out_ref[2:3, :] = ineql_v
        out_ref[3:4, :] = biasl_v
        out_ref[4:5, :] = inequ_v
        out_ref[5:6, :] = biasu_v
        out_ref[6:8, :] = jnp.zeros((2, out_ref.shape[1]), out_ref.dtype)


@jax.jit
def dp_relu_fused(root_l, root_u, Wl, bl, Wu, bu):
    """Resolve bounds through (Wl, bl, Wu, bu) and compute the ReLU relaxation
    in a single pallas_call. Returns (lb, ub, ineql_vec, biasl, inequ_vec,
    biasu), all shaped (1, N)."""
    N, K = Wl.shape
    tn, tk, Kp = _fused_tiles(N, K)

    rl = root_l.astype(jnp.float32)
    ru = root_u.astype(jnp.float32)
    wl = Wl.astype(jnp.float32)
    wu = Wu.astype(jnp.float32)
    bl = bl.astype(jnp.float32)
    bu = bu.astype(jnp.float32)

    if Kp != K:
        # zero-pad the contraction axis (zeros contribute nothing to the dots)
        pad = Kp - K
        rl = jnp.pad(rl, ((0, 0), (0, pad)))
        ru = jnp.pad(ru, ((0, 0), (0, pad)))
        wl = jnp.pad(wl, ((0, 0), (0, pad)))
        wu = jnp.pad(wu, ((0, 0), (0, pad)))

    out = pl.pallas_call(
        _dp_relu_fused_kernel,
        out_shape=jax.ShapeDtypeStruct((8, N), jnp.float32),
        grid_spec=pltpu.PrefetchScalarGridSpec(
            num_scalar_prefetch=0,
            grid=(N // tn, Kp // tk),
            in_specs=[
                pl.BlockSpec((1, tk), lambda j, k: (0, k)),    # root lower
                pl.BlockSpec((1, tk), lambda j, k: (0, k)),    # root upper
                pl.BlockSpec((tn, tk), lambda j, k: (j, k)),   # Wl (native layout)
                pl.BlockSpec((tn, tk), lambda j, k: (j, k)),   # Wu (native layout)
                pl.BlockSpec((1, tn), lambda j, k: (0, j)),    # bl
                pl.BlockSpec((1, tn), lambda j, k: (0, j)),    # bu
            ],
            out_specs=pl.BlockSpec((8, tn), lambda j, k: (0, j)),
            scratch_shapes=[pltpu.VMEM((1, tn), jnp.float32),
                            pltpu.VMEM((1, tn), jnp.float32)],
        ),
        compiler_params=pltpu.CompilerParams(
            dimension_semantics=("parallel", "arbitrary")),
    )(rl, ru, wl, wu, bl, bu)

    return (out[0:1], out[1:2], out[2:3], out[3:4], out[4:5], out[5:6])


# ----------------------------------------------------------------------------
# Kernel 2: expand (1, N) diagonal vectors into dense (N, N) diag matrices
# (required by the original module interface). Full-width row slabs: every
# store is lane-dense, grid steps = N / tr instead of (N / t)^2.
# ----------------------------------------------------------------------------
def _diag_expand_kernel(vecl_ref, vecu_ref, dl_ref, du_ref):
    i = pl.program_id(0)
    tr, n = dl_ref.shape
    local_row = jax.lax.broadcasted_iota(jnp.int32, (tr, n), 0)
    col = jax.lax.broadcasted_iota(jnp.int32, (tr, n), 1)
    eye = col == (local_row + i * tr)
    dl_ref[...] = jnp.where(eye, vecl_ref[...], 0.0)
    du_ref[...] = jnp.where(eye, vecu_ref[...], 0.0)


@jax.jit
def diag_expand(vecl, vecu):
    N = vecl.shape[1]
    tr = _diag_row_tile(N)
    mat = jax.ShapeDtypeStruct((N, N), jnp.float32)
    return pl.pallas_call(
        _diag_expand_kernel,
        out_shape=(mat, mat),
        grid_spec=pltpu.PrefetchScalarGridSpec(
            num_scalar_prefetch=0,
            grid=(N // tr,),
            in_specs=[
                pl.BlockSpec((1, N), lambda i: (0, 0)),
                pl.BlockSpec((1, N), lambda i: (0, 0)),
            ],
            out_specs=(
                pl.BlockSpec((tr, N), lambda i: (i, 0)),
                pl.BlockSpec((tr, N), lambda i: (i, 0)),
            ),
        ),
        compiler_params=pltpu.CompilerParams(
            dimension_semantics=("parallel",)),
    )(vecl.astype(jnp.float32), vecu.astype(jnp.float32))


# ----------------------------------------------------------------------------
# Kernel 3: relaxation-only path (input shape already has concrete bounds).
# Tiny elementwise work; single block.
# ----------------------------------------------------------------------------
def _relax_only_kernel(l_ref, u_ref, ineql_ref, biasl_ref, inequ_ref, biasu_ref):
    ineql_v, biasl_v, inequ_v, biasu_v = _relax_math(l_ref[...], u_ref[...])
    ineql_ref[...] = ineql_v
    biasl_ref[...] = biasl_v
    inequ_ref[...] = inequ_v
    biasu_ref[...] = biasu_v


@jax.jit
def relu_relax_vectors(lbounds, ubounds):
    N = lbounds.shape[1]
    vec = jax.ShapeDtypeStruct((1, N), jnp.float32)
    return pl.pallas_call(
        _relax_only_kernel,
        out_shape=(vec, vec, vec, vec),
    )(lbounds.astype(jnp.float32), ubounds.astype(jnp.float32))


# ----------------------------------------------------------------------------
# DP_Shape / DP_ReLU (JAX mirror of the PyTorch classes)
# ----------------------------------------------------------------------------
class DPShape:
    def __init__(self, lbounds=None, ubounds=None, parent=None, transform=None):
        self.parent = parent
        self._lbounds = lbounds
        self._ubounds = ubounds
        self.transform = transform

    @classmethod
    def from_eps(cls, inputs, eps, clamp, validate=False):
        lo = jnp.clip(inputs - eps, clamp[0], clamp[1])
        hi = jnp.clip(inputs + eps, clamp[0], clamp[1])
        if validate:  # debug-only: forces a device->host sync
            assert bool(jnp.all(lo <= hi)), "Invalid bounding boxes."
        return cls(lbounds=lo, ubounds=hi)

    @classmethod
    def from_transform(cls, parent, ineql, biasl, inequ, biasu):
        return cls(parent=parent, transform=(ineql, biasl, inequ, biasu))

    @property
    def lbounds(self):
        assert self._lbounds is not None
        return self._lbounds

    @property
    def ubounds(self):
        assert self._ubounds is not None
        return self._ubounds

    def _compose_to_root(self):
        """Compose this shape's transform down to the concrete root shape."""
        fineql, fbiasl, finequ, fbiasu = self.transform
        shape = self.parent
        while shape.transform is not None:
            # TODO(synk): multi-level transform composition stays in plain JAX
            # (not exercised by the single-linear-layer example).
            sineql, sbiasl, sinequ, sbiasu = shape.transform
            fineql_pos = jnp.where(fineql > 0, fineql, 0.0)
            fineql_neg = jnp.where(fineql < 0, fineql, 0.0)
            finequ_pos = jnp.where(finequ > 0, finequ, 0.0)
            finequ_neg = jnp.where(finequ < 0, finequ, 0.0)
            fbiasl = sbiasl @ fineql_pos.T + sbiasu @ fineql_neg.T + fbiasl
            fbiasu = sbiasu @ finequ_pos.T + sbiasl @ finequ_neg.T + fbiasu
            fineql = fineql_pos @ sineql + fineql_neg @ sinequ
            finequ = finequ_pos @ sinequ + finequ_neg @ sineql
            shape = shape.parent
        return fineql, fbiasl, finequ, fbiasu, shape

    def backsub(self):
        if self._lbounds is not None and self._ubounds is not None:
            return
        fineql, fbiasl, finequ, fbiasu, root = self._compose_to_root()
        # Reuses the fused kernel; the (cheap) ReLU-relaxation outputs are
        # simply discarded on this generic-backsub path.
        lb, ub, *_ = dp_relu_fused(root._lbounds, root._ubounds,
                                   fineql, fbiasl, finequ, fbiasu)
        self._lbounds, self._ubounds = lb, ub


class DPReLU:
    """Pallas equivalent of DP_ReLU.forward (resolve + relax fused)."""

    def __call__(self, in_shape: DPShape) -> DPShape:
        if in_shape._lbounds is not None and in_shape._ubounds is not None:
            # Bounds already concrete -> relaxation-only kernel.
            lb, ub = in_shape.lbounds, in_shape.ubounds
            _, N = lb.shape
            assert lb.shape == ub.shape == (1, N)
            ineql_v, biasl, inequ_v, biasu = relu_relax_vectors(lb, ub)
        else:
            # Fused backsub(resolve) + relaxation in one pallas_call.
            fineql, fbiasl, finequ, fbiasu, root = in_shape._compose_to_root()
            lb, ub, ineql_v, biasl, inequ_v, biasu = dp_relu_fused(
                root._lbounds, root._ubounds, fineql, fbiasl, finequ, fbiasu)
            in_shape._lbounds, in_shape._ubounds = lb, ub   # backsub side effect
        # Dense diagonal matrices: only because the original module interface
        # returns them. TODO(synk): downstream composition could consume the
        # (1, N) vectors directly (diag left-factor == row scale) and skip this.
        ineql_d, inequ_d = diag_expand(ineql_v, inequ_v)
        return DPShape.from_transform(in_shape, ineql_d, biasl, inequ_d, biasu)


# ----------------------------------------------------------------------------
# Pure-JAX references for verification
# ----------------------------------------------------------------------------
def ref_resolve(rl, ru, Wl, bl, Wu, bu):
    Wl_pos = jnp.where(Wl > 0, Wl, 0.0); Wl_neg = jnp.where(Wl < 0, Wl, 0.0)
    Wu_pos = jnp.where(Wu > 0, Wu, 0.0); Wu_neg = jnp.where(Wu < 0, Wu, 0.0)
    lo = rl @ Wl_pos.T + ru @ Wl_neg.T + bl
    hi = ru @ Wu_pos.T + rl @ Wu_neg.T + bu
    return lo, hi


def ref_relax_vectors(l, u):
    slope = u / (u - l)
    slope = jnp.where(jnp.isnan(slope), 0.0, slope)
    intercept = (1.0 - slope) * u
    below = u < 0.0
    above = l > 0.0
    crossing = (~below) & (~above)
    ineql = jnp.where(above, 1.0, 0.0)
    inequ = jnp.where(crossing, slope, ineql)
    biasl = jnp.zeros_like(l)
    biasu = jnp.where(crossing, intercept, 0.0)
    return ineql, biasl, inequ, biasu


# ----------------------------------------------------------------------------
if __name__ == "__main__":
    K = 128   # input features of the preceding linear layer
    N = 128   # neurons feeding the ReLU

    key = jax.random.PRNGKey(0)
    kx, kw, kb = jax.random.split(key, 3)

    x = jax.random.uniform(kx, (1, K), jnp.float32)            # "image" row vector
    eps = jnp.float32(0.1)
    root = DPShape.from_eps(x, eps, (0.0, 1.0))                # concrete input box

    # deterministic synthetic linear layer (affine: same ineq for lower/upper)
    W = jax.random.normal(kw, (N, K), jnp.float32) * 0.1
    b = jax.random.normal(kb, (1, N), jnp.float32) * 0.1
    lin_shape = DPShape.from_transform(root, W, b, W, b)

    relu = DPReLU()
    out_shape = relu(lin_shape)                                # forward pass

    ineql_d, biasl, inequ_d, biasu = out_shape.transform
    jax.block_until_ready((ineql_d, biasl, inequ_d, biasu,
                           lin_shape._lbounds, lin_shape._ubounds))

    # --- verification against pure-JAX references ---------------------------
    # 1) resolved bounds
    rl_ref, ru_ref = ref_resolve(root.lbounds, root.ubounds, W, b, W, b)
    assert jnp.allclose(lin_shape._lbounds, rl_ref, rtol=1e-4, atol=1e-4)
    assert jnp.allclose(lin_shape._ubounds, ru_ref, rtol=1e-4, atol=1e-4)

    # 2) relaxation vectors from the fused kernel
    lb, ub, ineql_v, biasl_v, inequ_v, biasu_v = dp_relu_fused(
        root.lbounds, root.ubounds, W, b, W, b)
    r_il, r_bl, r_iu, r_bu = ref_relax_vectors(lb, ub)
    assert jnp.allclose(ineql_v, r_il, rtol=1e-5, atol=1e-5)
    assert jnp.allclose(biasl_v, r_bl, rtol=1e-5, atol=1e-5)
    assert jnp.allclose(inequ_v, r_iu, rtol=1e-5, atol=1e-5)
    assert jnp.allclose(biasu_v, r_bu, rtol=1e-5, atol=1e-5)

    # 3) dense diagonals and biases returned by the module
    assert jnp.allclose(ineql_d, jnp.diag(ineql_v[0]), rtol=1e-5, atol=1e-5)
    assert jnp.allclose(inequ_d, jnp.diag(inequ_v[0]), rtol=1e-5, atol=1e-5)
    assert jnp.allclose(biasl, r_bl, rtol=1e-5, atol=1e-5)
    assert jnp.allclose(biasu, r_bu, rtol=1e-5, atol=1e-5)

    # 4) relaxation-only kernel (concrete-bounds path)
    o_il, o_bl, o_iu, o_bu = relu_relax_vectors(lb, ub)
    assert jnp.allclose(o_il, r_il, rtol=1e-5, atol=1e-5)
    assert jnp.allclose(o_bl, r_bl, rtol=1e-5, atol=1e-5)
    assert jnp.allclose(o_iu, r_iu, rtol=1e-5, atol=1e-5)
    assert jnp.allclose(o_bu, r_bu, rtol=1e-5, atol=1e-5)

    print("KERNEL_OK")
</pallas_src>

<mosaic_0001>
module attributes {stable_mosaic.version = 11 : i64} {
  func.func @_dp_relu_fused_kernel(%arg0: i32, %arg1: i32, %arg2: memref<1x128xf32, #tpu.memory_space<vmem>>, %arg3: memref<1x128xf32, #tpu.memory_space<vmem>>, %arg4: memref<128x128xf32, #tpu.memory_space<vmem>>, %arg5: memref<128x128xf32, #tpu.memory_space<vmem>>, %arg6: memref<1x128xf32, #tpu.memory_space<vmem>>, %arg7: memref<1x128xf32, #tpu.memory_space<vmem>>, %arg8: memref<8x128xf32, #tpu.memory_space<vmem>>, %arg9: memref<1x128xf32, #tpu.memory_space<vmem>>, %arg10: memref<1x128xf32, #tpu.memory_space<vmem>>) attributes {dimension_semantics = [#tpu.dimension_semantics<parallel>, #tpu.dimension_semantics<arbitrary>], iteration_bounds = array<i64: 1, 1>, scalar_prefetch = 0 : i64, scratch_operands = 2 : i64, tpu.core_type = #tpu.core_type<tc>, window_params = [{transform_indices = @transform_0, window_bounds = array<i64: 1, 128>}, {transform_indices = @transform_1, window_bounds = array<i64: 1, 128>}, {transform_indices = @transform_2, window_bounds = array<i64: 128, 128>}, {transform_indices = @transform_3, window_bounds = array<i64: 128, 128>}, {transform_indices = @transform_4, window_bounds = array<i64: 1, 128>}, {transform_indices = @transform_5, window_bounds = array<i64: 1, 128>}, {transform_indices = @transform_6, window_bounds = array<i64: 8, 128>}]} {
    %c0_i32 = arith.constant 0 : i32
    %0 = arith.cmpi eq, %arg1, %c0_i32 : i32
    %1 = arith.extui %0 : i1 to i32
    %c0_i32_0 = arith.constant 0 : i32
    %2 = arith.cmpi ne, %1, %c0_i32_0 : i32
    scf.if %2 {
      %cst_21 = arith.constant 0.000000e+00 : f32
      %26 = vector.broadcast %cst_21 : f32 to vector<1x128xf32>
      %c0_22 = arith.constant 0 : index
      %c0_23 = arith.constant 0 : index
      %27 = vector.load %arg9[%c0_22, %c0_23] : memref<1x128xf32, #tpu.memory_space<vmem>>, vector<1x128xf32>
      tpu.vector_store %arg9[%c0_22, %c0_23], %26 {strides = array<i32>} : memref<1x128xf32, #tpu.memory_space<vmem>>, vector<1x128xf32>,
      %cst_24 = arith.constant 0.000000e+00 : f32
      %28 = vector.broadcast %cst_24 : f32 to vector<1x128xf32>
      %c0_25 = arith.constant 0 : index
      %c0_26 = arith.constant 0 : index
      %29 = vector.load %arg10[%c0_25, %c0_26] : memref<1x128xf32, #tpu.memory_space<vmem>>, vector<1x128xf32>
      tpu.vector_store %arg10[%c0_25, %c0_26], %28 {strides = array<i32>} : memref<1x128xf32, #tpu.memory_space<vmem>>, vector<1x128xf32>,
    } else {
    }
    %c0 = arith.constant 0 : index
    %c0_1 = arith.constant 0 : index
    %3 = vector.load %arg2[%c0, %c0_1] : memref<1x128xf32, #tpu.memory_space<vmem>>, vector<1x128xf32>
    %c0_2 = arith.constant 0 : index
    %c0_3 = arith.constant 0 : index
    %4 = vector.load %arg3[%c0_2, %c0_3] : memref<1x128xf32, #tpu.memory_space<vmem>>, vector<1x128xf32>
    %5 = arith.addf %3, %4 : vector<1x128xf32>
    %6 = arith.subf %3, %4 : vector<1x128xf32>
    %c0_4 = arith.constant 0 : index
    %c0_5 = arith.constant 0 : index
    %7 = vector.load %arg4[%c0_4, %c0_5] : memref<128x128xf32, #tpu.memory_space<vmem>>, vector<128x128xf32>
    %c0_6 = arith.constant 0 : index
    %c0_7 = arith.constant 0 : index
    %8 = vector.load %arg5[%c0_6, %c0_7] : memref<128x128xf32, #tpu.memory_space<vmem>>, vector<128x128xf32>
    %c0_8 = arith.constant 0 : index
    %c0_9 = arith.constant 0 : index
    %9 = vector.load %arg9[%c0_8, %c0_9] : memref<1x128xf32, #tpu.memory_space<vmem>>, vector<1x128xf32>
    %cst = arith.constant dense<0.000000e+00> : vector<1x128xf32>
    %10 = tpu.matmul %5, %7, %cst {dimension_numbers = #tpu.dot_dimension_numbers<[1], [1], [0], [0], [0, 0, 1, 0], [], []>} : vector<1x128xf32>, vector<128x128xf32>, vector<1x128xf32> -> vector<1x128xf32>
    %11 = math.absf %7 : vector<128x128xf32>
    %cst_10 = arith.constant dense<0.000000e+00> : vector<1x128xf32>
    %12 = tpu.matmul %6, %11, %cst_10 {dimension_numbers = #tpu.dot_dimension_numbers<[1], [1], [0], [0], [0, 0, 1, 0], [], []>} : vector<1x128xf32>, vector<128x128xf32>, vector<1x128xf32> -> vector<1x128xf32>
    %13 = arith.addf %10, %12 : vector<1x128xf32>
    %14 = arith.addf %9, %13 : vector<1x128xf32>
    %c0_11 = arith.constant 0 : index
    %c0_12 = arith.constant 0 : index
    %15 = vector.load %arg9[%c0_11, %c0_12] : memref<1x128xf32, #tpu.memory_space<vmem>>, vector<1x128xf32>
    tpu.vector_store %arg9[%c0_11, %c0_12], %14 {strides = array<i32>} : memref<1x128xf32, #tpu.memory_space<vmem>>, vector<1x128xf32>,
    %c0_13 = arith.constant 0 : index
    %c0_14 = arith.constant 0 : index
    %16 = vector.load %arg10[%c0_13, %c0_14] : memref<1x128xf32, #tpu.memory_space<vmem>>, vector<1x128xf32>
    %cst_15 = arith.constant dense<0.000000e+00> : vector<1x128xf32>
    %17 = tpu.matmul %5, %8, %cst_15 {dimension_numbers = #tpu.dot_dimension_numbers<[1], [1], [0], [0], [0, 0, 1, 0], [], []>} : vector<1x128xf32>, vector<128x128xf32>, vector<1x128xf32> -> vector<1x128xf32>
    %18 = math.absf %8 : vector<128x128xf32>
    %cst_16 = arith.constant dense<0.000000e+00> : vector<1x128xf32>
    %19 = tpu.matmul %6, %18, %cst_16 {dimension_numbers = #tpu.dot_dimension_numbers<[1], [1], [0], [0], [0, 0, 1, 0], [], []>} : vector<1x128xf32>, vector<128x128xf32>, vector<1x128xf32> -> vector<1x128xf32>
    %20 = arith.subf %17, %19 : vector<1x128xf32>
    %21 = arith.addf %16, %20 : vector<1x128xf32>
    %c0_17 = arith.constant 0 : index
    %c0_18 = arith.constant 0 : index
    %22 = vector.load %arg10[%c0_17, %c0_18] : memref<1x128xf32, #tpu.memory_space<vmem>>, vector<1x128xf32>
    tpu.vector_store %arg10[%c0_17, %c0_18], %21 {strides = array<i32>} : memref<1x128xf32, #tpu.memory_space<vmem>>, vector<1x128xf32>,
    %c0_i32_19 = arith.constant 0 : i32
    %23 = arith.cmpi eq, %arg1, %c0_i32_19 : i32
    %24 = arith.extui %23 : i1 to i32
    %c0_i32_20 = arith.constant 0 : i32
    %25 = arith.cmpi ne, %24, %c0_i32_20 : i32
    scf.if %25 {
      %c0_21 = arith.constant 0 : index
      %c0_22 = arith.constant 0 : index
      %26 = vector.load %arg9[%c0_21, %c0_22] : memref<1x128xf32, #tpu.memory_space<vmem>>, vector<1x128xf32>
      %cst_23 = arith.constant 5.000000e-01 : f32
      %27 = vector.broadcast %cst_23 : f32 to vector<1x128xf32>
      %28 = arith.mulf %27, %26 : vector<1x128xf32>
      %c0_24 = arith.constant 0 : index
      %c0_25 = arith.constant 0 : index
      %29 = vector.load %arg6[%c0_24, %c0_25] : memref<1x128xf32, #tpu.memory_space<vmem>>, vector<1x128xf32>
      %30 = arith.addf %28, %29 : vector<1x128xf32>
      %c0_26 = arith.constant 0 : index
      %c0_27 = arith.constant 0 : index
      %31 = vector.load %arg10[%c0_26, %c0_27] : memref<1x128xf32, #tpu.memory_space<vmem>>, vector<1x128xf32>
      %cst_28 = arith.constant 5.000000e-01 : f32
      %32 = vector.broadcast %cst_28 : f32 to vector<1x128xf32>
      %33 = arith.mulf %32, %31 : vector<1x128xf32>
      %c0_29 = arith.constant 0 : index
      %c0_30 = arith.constant 0 : index
      %34 = vector.load %arg7[%c0_29, %c0_30] : memref<1x128xf32, #tpu.memory_space<vmem>>, vector<1x128xf32>
      %35 = arith.addf %33, %34 : vector<1x128xf32>
      %36 = arith.subf %35, %30 : vector<1x128xf32>
      %37 = arith.divf %35, %36 : vector<1x128xf32>
      %38 = arith.cmpf one, %37, %37 : vector<1x128xf32>
      %cst_31 = arith.constant 0.000000e+00 : f32
      %39 = vector.broadcast %cst_31 : f32 to vector<1x128xf32>
      %40 = arith.select %38, %39, %37 : vector<1x128xi1>, vector<1x128xf32>
      %cst_32 = arith.constant 1.000000e+00 : f32
      %41 = vector.broadcast %cst_32 : f32 to vector<1x128xf32>
      %42 = arith.subf %41, %40 : vector<1x128xf32>
      %43 = arith.mulf %42, %35 : vector<1x128xf32>
      %cst_33 = arith.constant 0.000000e+00 : f32
      %44 = vector.broadcast %cst_33 : f32 to vector<1x128xf32>
      %45 = arith.cmpf olt, %35, %44 : vector<1x128xf32>
      %cst_34 = arith.constant 0.000000e+00 : f32
      %46 = vector.broadcast %cst_34 : f32 to vector<1x128xf32>
      %47 = arith.cmpf ogt, %30, %46 : vector<1x128xf32>
      %cst_35 = arith.constant dense<true> : vector<1x128xi1>
      %48 = arith.xori %45, %cst_35 : vector<1x128xi1>
      %cst_36 = arith.constant dense<true> : vector<1x128xi1>
      %49 = arith.xori %47, %cst_36 : vector<1x128xi1>
      %50 = arith.andi %48, %49 : vector<1x128xi1>
      %cst_37 = arith.constant 1.000000e+00 : f32
      %51 = vector.broadcast %cst_37 : f32 to vector<1x128xf32>
      %cst_38 = arith.constant 0.000000e+00 : f32
      %52 = vector.broadcast %cst_38 : f32 to vector<1x128xf32>
      %53 = arith.select %47, %51, %52 : vector<1x128xi1>, vector<1x128xf32>
      %54 = arith.select %50, %40, %53 : vector<1x128xi1>, vector<1x128xf32>
      %55 = arith.select %50, %43, %52 : vector<1x128xi1>, vector<1x128xf32>
      %c0_39 = arith.constant 0 : index
      %c0_40 = arith.constant 0 : index
      %56 = vector.load %arg8[%c0_39, %c0_40] : memref<8x128xf32, #tpu.memory_space<vmem>>, vector<1x128xf32>
      tpu.vector_store %arg8[%c0_39, %c0_40], %30 {strides = array<i32>} : memref<8x128xf32, #tpu.memory_space<vmem>>, vector<1x128xf32>,
      %c1 = arith.constant 1 : index
      %c0_41 = arith.constant 0 : index
      %57 = vector.load %arg8[%c1, %c0_41] : memref<8x128xf32, #tpu.memory_space<vmem>>, vector<1x128xf32>
      tpu.vector_store %arg8[%c1, %c0_41], %35 {strides = array<i32>} : memref<8x128xf32, #tpu.memory_space<vmem>>, vector<1x128xf32>,
      %c2 = arith.constant 2 : index
      %c0_42 = arith.constant 0 : index
      %58 = vector.load %arg8[%c2, %c0_42] : memref<8x128xf32, #tpu.memory_space<vmem>>, vector<1x128xf32>
      tpu.vector_store %arg8[%c2, %c0_42], %53 {strides = array<i32>} : memref<8x128xf32, #tpu.memory_space<vmem>>, vector<1x128xf32>,
      %c3 = arith.constant 3 : index
      %c0_43 = arith.constant 0 : index
      %59 = vector.load %arg8[%c3, %c0_43] : memref<8x128xf32, #tpu.memory_space<vmem>>, vector<1x128xf32>
      tpu.vector_store %arg8[%c3, %c0_43], %52 {strides = array<i32>} : memref<8x128xf32, #tpu.memory_space<vmem>>, vector<1x128xf32>,
      %c4 = arith.constant 4 : index
      %c0_44 = arith.constant 0 : index
      %60 = vector.load %arg8[%c4, %c0_44] : memref<8x128xf32, #tpu.memory_space<vmem>>, vector<1x128xf32>
      tpu.vector_store %arg8[%c4, %c0_44], %54 {strides = array<i32>} : memref<8x128xf32, #tpu.memory_space<vmem>>, vector<1x128xf32>,
      %c5 = arith.constant 5 : index
      %c0_45 = arith.constant 0 : index
      %61 = vector.load %arg8[%c5, %c0_45] : memref<8x128xf32, #tpu.memory_space<vmem>>, vector<1x128xf32>
      tpu.vector_store %arg8[%c5, %c0_45], %55 {strides = array<i32>} : memref<8x128xf32, #tpu.memory_space<vmem>>, vector<1x128xf32>,
      %cst_46 = arith.constant 0.000000e+00 : f32
      %62 = vector.broadcast %cst_46 : f32 to vector<2x128xf32>
      %c6 = arith.constant 6 : index
      %c0_47 = arith.constant 0 : index
      %63 = vector.load %arg8[%c6, %c0_47] : memref<8x128xf32, #tpu.memory_space<vmem>>, vector<2x128xf32>
      tpu.vector_store %arg8[%c6, %c0_47], %62 {strides = array<i32>} : memref<8x128xf32, #tpu.memory_space<vmem>>, vector<2x128xf32>,
    } else {
    }
    return
  }
  func.func @transform_0(%arg0: i32, %arg1: i32) -> (i32, i32) {
    %c0_i32 = arith.constant 0 : i32
    %c0_i32_0 = arith.constant 0 : i32
    return %c0_i32, %arg1 : i32, i32
  }
  func.func @transform_1(%arg0: i32, %arg1: i32) -> (i32, i32) {
    %c0_i32 = arith.constant 0 : i32
    %c0_i32_0 = arith.constant 0 : i32
    return %c0_i32, %arg1 : i32, i32
  }
  func.func @transform_2(%arg0: i32, %arg1: i32) -> (i32, i32) {
    %c0_i32 = arith.constant 0 : i32
    return %arg0, %arg1 : i32, i32
  }
  func.func @transform_3(%arg0: i32, %arg1: i32) -> (i32, i32) {
    %c0_i32 = arith.constant 0 : i32
    return %arg0, %arg1 : i32, i32
  }
  func.func @transform_4(%arg0: i32, %arg1: i32) -> (i32, i32) {
    %c0_i32 = arith.constant 0 : i32
    %c0_i32_0 = arith.constant 0 : i32
    return %c0_i32, %arg0 : i32, i32
  }
  func.func @transform_5(%arg0: i32, %arg1: i32) -> (i32, i32) {
    %c0_i32 = arith.constant 0 : i32
    %c0_i32_0 = arith.constant 0 : i32
    return %c0_i32, %arg0 : i32, i32
  }
  func.func @transform_6(%arg0: i32, %arg1: i32) -> (i32, i32) {
    %c0_i32 = arith.constant 0 : i32
    %c0_i32_0 = arith.constant 0 : i32
    return %c0_i32, %arg0 : i32, i32
  }
}

</mosaic_0001>

<bundles_post_ra>
// kernel: dp_relu_fused.1
= control target key start
LH: loop header
LB: loop body
LE: loop exit
PB: predicated region body
PF: predicated region fallthrough
CT: control target
= control target key end

     0   :  { %11 = vsyncpa [#allocation5], 0  ;;  %s1018_s0 = inlined_call_operand.hbm [shape: f32[1,128], index: 0, kind: input, shape index: {}]   ;;  %s1019_s1 = inlined_call_operand.vmem [shape: f32[1,128], index: 1, kind: input, shape index: {}]   ;;  %s1020_s2 = inlined_call_operand.hbm [shape: f32[128,128], index: 2, kind: input, shape index: {}]   ;;  %s1021_s3 = inlined_call_operand.hbm [shape: f32[128,128], index: 3, kind: input, shape index: {}]   ;;  %s1022_s4 = inlined_call_operand.vmem [shape: f32[1,128], index: 4, kind: input, shape index: {}]   ;;  %s1023_s5 = inlined_call_operand.vmem [shape: f32[1,128], index: 5, kind: input, shape index: {}]   ;;  %s1024_s6 = inlined_call_operand.vmem [shape: f32[8,128], index: 6, kind: output, shape index: {}]  }
   0x1   :  { %12 = vsyncpa [#allocation7], 0  ;;  %s847_s21 = smov [#allocation6]   ;;  %s777_s25 = scalar_lea.hbm %s1020_s2, 2048 }
   0x2   :  { %s30_s22 = sshll.u32 %s847_s21, 4  ;;  %p778_p0 = scmp.ne.s32.totalorder %s1020_s2, %s777_s25  ;;  %s31_s22 = int_to_ptr.vmem [resolvable:$true] %s30_s22 }
   0x3   :  { %p781_p1 = scmp.lt.u32.totalorder %s777_s25, %s1020_s2 }
   0x5   :  { %p783_p2 = pnand %p781_p1, %p778_p0 }
   0x7   :  { %786 = shalt.err (!%p783_p2)
}
   0x8   :  { %s787_s30 = scalar_lea.vmem %s31_s22, 2048  ;;  %p792_p4 = scmp.lt.s32.totalorder %s31_s22, %s31_s22 }
   0x9   :  { %p788_p3 = scmp.ne.s32.totalorder %s31_s22, %s787_s30  ;;  %p793_p5 = scmp.lt.s32.totalorder %s787_s30, %s787_s30 }
   0xb   :  { %p794_p6 = por %p793_p5, %p792_p4 }
   0xd   :  { %p795_p7 = pnand %p794_p6, %p788_p3 }
   0xf   :  { %798 = shalt.err (!%p795_p7)
}
  0x10   :  { %s848_s7 = smov 128   ;;  %s849_s8 = smov 8  }
  0x11   :  { %36 = dma.hbm_to_vmem [thread:$0]  %s1020_s2, 2048, %s31_s22, [#allocation7], %s848_s7, %s848_s7, %s849_s8  }
  0x12   :  { %s850_s11 = smov [#allocation4]   ;;  %s851_s13 = smov [#allocation8]  }
  0x13   :  { %s19_s12 = sshll.u32 %s850_s11, 4  ;;  %s42_s14 = sshll.u32 %s851_s13, 4  ;;  %s20_s12 = int_to_ptr.vmem [resolvable:$true] %s19_s12  ;;  %s43_s14 = int_to_ptr.vmem [resolvable:$true] %s42_s14 }
  0x14   :  { %s799_s17 = scalar_lea.hbm %s1018_s0, 16 }
  0x15   :  { %p800_p8 = scmp.ne.s32.totalorder %s1018_s0, %s799_s17  ;;  %p803_p9 = scmp.lt.u32.totalorder %s799_s17, %s1018_s0 }
  0x17   :  { %p805_p10 = pnand %p803_p9, %p800_p8 }
  0x19   :  { %808 = shalt.err (!%p805_p10)
}
  0x1a   :  { %s809_s2 = scalar_lea.vmem %s20_s12, 16  ;;  %s813_s22 = scalar_lea.vmem %s20_s12, 32 }
  0x1b   :  { %p810_p11 = scmp.ne.s32.totalorder %s20_s12, %s809_s2  ;;  %p814_p12 = scmp.lt.s32.totalorder %s20_s12, %s20_s12 }
  0x1c   :  { %p815_p13 = scmp.lt.s32.totalorder %s813_s22, %s809_s2 }
  0x1e   :  { %p816_p0 = por %p815_p13, %p814_p12 }
  0x20   :  { %p817_p1 = pnand %p816_p0, %p810_p11 }
  0x22   :  { %820 = shalt.err (!%p817_p1)
}
  0x23   :  { %22 = dma.hbm_to_vmem [thread:$0]  %s1018_s0, 16, %s20_s12, [#allocation5]  }
  0x24   :  { %s821_s27 = scalar_lea.hbm %s1021_s3, 2048 }
  0x25   :  { %p822_p2 = scmp.ne.s32.totalorder %s1021_s3, %s821_s27  ;;  %p825_p3 = scmp.lt.u32.totalorder %s821_s27, %s1021_s3 }
  0x27   :  { %p827_p4 = pnand %p825_p3, %p822_p2 }
  0x29   :  { %830 = shalt.err (!%p827_p4)
}
  0x2a   :  { %s831_s10 = scalar_lea.vmem %s43_s14, 2048  ;;  %p836_p6 = scmp.lt.s32.totalorder %s43_s14, %s43_s14 }
  0x2b   :  { %p832_p5 = scmp.ne.s32.totalorder %s43_s14, %s831_s10  ;;  %p837_p7 = scmp.lt.s32.totalorder %s831_s10, %s831_s10 }
  0x2d   :  { %p838_p8 = por %p837_p7, %p836_p6 }
  0x2f   :  { %p839_p9 = pnand %p838_p8, %p832_p5 }
  0x31   :  { %842 = shalt.err (!%p839_p9)
}
  0x32   :  { %48 = dma.hbm_to_vmem [thread:$0]  %s1021_s3, 2048, %s43_s14, [#allocation7], %s848_s7, %s848_s7, %s849_s8  }
  0x33   :  { %843 = dma.done.wait [#allocation5], 16  }
  0x34   :  { %844 = vsyncadd [#allocation5], 4294967280 }
  0x35   :  { %845 = dma.done.wait [#allocation7], 4096  }
  0x36   :  { %846 = vsyncadd [#allocation7], 4294963200  ;;  %v852_v0 = vmov 0.0|0.0   ;;  %v853_v1 = vmov 0.0   ;;  %vm854_vm0 = vmmov 0   ;;  %v72_v2 = vld [vmem:[#allocation6] sm:$0xff] }
  0x37   :  { %694 = vmatprep.subr.bf16.mxu1 %v852_v0  ;;  %670 = vmatprep.subr.bf16.mxu0 %v852_v0  ;;  %452 = vst [vmem:[%s1024_s6 + $0x3] sm:$0x1] %v853_v1  ;;  %455 = vst [vmem:[%s1024_s6 + $0x6] sm:$0x3] %v853_v1  ;;  %v73_v3 = vld [vmem:[#allocation6 + $0x8] sm:$0xff]  ;;  %v74_v7 = vld [vmem:[#allocation6 + $0x10] sm:$0xff] }
  0x38   :  { %66 = vst [vmem:[#allocation2] sm:$0x1] %v853_v1  ;;  %67 = vst [vmem:[#allocation3] sm:$0x1] %v853_v1  ;;  %562 = vmatprep.mubr.msk.f32.mxu0 %vm854_vm0, %v853_v1  ;;  %597 = vmatprep.mubr.msk.f32.mxu1 %vm854_vm0, %v853_v1  ;;  %v695_v4 = vpack.c.bf16 %v73_v3, %v72_v2  ;;  %v105_v5 = vand.u32 2147483647, %v72_v2 }
  0x39   :  { %v106_v6 = vand.u32 2147483647, %v73_v3  ;;  %v75_v8 = vld [vmem:[#allocation6 + $0x18] sm:$0xff]  ;;  %v107_v10 = vand.u32 2147483647, %v74_v7  ;;  %v76_v14 = vld [vmem:[#allocation6 + $0x20] sm:$0xff] }
  0x3a   :  { %696 = vmatpush3.bf16.xpose.msra.mxu1 %v695_v4  ;;  %v108_v11 = vand.u32 2147483647, %v75_v8  ;;  %v698_v12 = vpack.c.bf16 %v75_v8, %v74_v7  ;;  %v77_v15 = vld [vmem:[#allocation6 + $0x28] sm:$0xff]  ;;  %v109_v16 = vand.u32 2147483647, %v76_v14  ;;  %v78_v20 = vld [vmem:[#allocation6 + $0x30] sm:$0xff] }
  0x3b   :  { %v671_v9 = vpack.c.bf16 %v106_v6, %v105_v5  ;;  %697 = vmatprep.subr.bf16.mxu1 %v852_v0  ;;  %v110_v17 = vand.u32 2147483647, %v77_v15  ;;  %v701_v18 = vpack.c.bf16 %v77_v15, %v76_v14  ;;  %v79_v21 = vld [vmem:[#allocation6 + $0x38] sm:$0xff]  ;;  %v111_v22 = vand.u32 2147483647, %v78_v20  ;;  %v80_v26 = vld [vmem:[#allocation6 + $0x40] sm:$0xff] }
  0x3c   :  { %v674_v13 = vpack.c.bf16 %v108_v11, %v107_v10  ;;  %v112_v23 = vand.u32 2147483647, %v79_v21  ;;  %v704_v24 = vpack.c.bf16 %v79_v21, %v78_v20  ;;  %v81_v27 = vld [vmem:[#allocation6 + $0x48] sm:$0xff]  ;;  %v113_v28 = vand.u32 2147483647, %v80_v26  ;;  %v82_v32 = vld [vmem:[#allocation6 + $0x50] sm:$0xff] }
  0x3d   :  { %672 = vmatpush3.bf16.xpose.msra.mxu0 %v671_v9  ;;  %v677_v19 = vpack.c.bf16 %v110_v17, %v109_v16  ;;  %v114_v29 = vand.u32 2147483647, %v81_v27  ;;  %v707_v30 = vpack.c.bf16 %v81_v27, %v80_v26  ;;  %v83_v33 = vld [vmem:[#allocation6 + $0x58] sm:$0xff]  ;;  %v115_v34 = vand.u32 2147483647, %v82_v32  ;;  %v84_v38 = vld [vmem:[#allocation6 + $0x60] sm:$0xff] }
  0x3e   :  { %673 = vmatprep.subr.bf16.mxu0 %v852_v0  ;;  %v680_v25 = vpack.c.bf16 %v112_v23, %v111_v22  ;;  %v116_v35 = vand.u32 2147483647, %v83_v33  ;;  %v710_v36 = vpack.c.bf16 %v83_v33, %v82_v32  ;;  %v85_v39 = vld [vmem:[#allocation6 + $0x68] sm:$0xff]  ;;  %v117_v40 = vand.u32 2147483647, %v84_v38  ;;  %v86_v44 = vld [vmem:[#allocation6 + $0x70] sm:$0xff] }
  0x3f   :  { %v683_v31 = vpack.c.bf16 %v114_v29, %v113_v28  ;;  %v118_v41 = vand.u32 2147483647, %v85_v39  ;;  %v713_v42 = vpack.c.bf16 %v85_v39, %v84_v38  ;;  %v87_v45 = vld [vmem:[#allocation6 + $0x78] sm:$0xff]  ;;  %v119_v46 = vand.u32 2147483647, %v86_v44  ;;  %v88_v49 = vld [vmem:[#allocation8] sm:$0xff] }
  0x40   :  { %v686_v37 = vpack.c.bf16 %v116_v35, %v115_v34  ;;  %v120_v47 = vand.u32 2147483647, %v87_v45  ;;  %v716_v48 = vpack.c.bf16 %v87_v45, %v86_v44  ;;  %v89_v50 = vld [vmem:[#allocation8 + $0x8] sm:$0xff]  ;;  %v68_v52 = vld [vmem:[#allocation4] sm:$0x1]  ;;  %v90_v59 = vld [vmem:[#allocation8 + $0x10] sm:$0xff] }
  0x41   :  { %v689_v43 = vpack.c.bf16 %v118_v41, %v117_v40  ;;  %v69_v53 = vld [vmem:[%s1019_s1] sm:$0x1]  ;;  %v334_v54 = vand.u32 2147483647, %v88_v49  ;;  %v335_v55 = vand.u32 2147483647, %v89_v50  ;;  %v719_v61 = vpack.c.bf16 %v89_v50, %v88_v49 }
  0x42   :  { %699 = vmatpush3.bf16.xpose.msra.mxu1 %v698_v12  ;;  %v692_v51 = vpack.c.bf16 %v120_v47, %v119_v46  ;;  %v967_v56 = vadd.f32 %v69_v53, %v68_v52  ;;  %v970_v58 = vsub.f32 %v68_v52, %v69_v53  ;;  %v91_v60 = vld [vmem:[#allocation8 + $0x18] sm:$0xff]  ;;  %v336_v62 = vand.u32 2147483647, %v90_v59  ;;  %v92_v3 = vld [vmem:[#allocation8 + $0x20] sm:$0xff]  ;;  %v93_v4 = vld [vmem:[#allocation8 + $0x28] sm:$0xff] }
  0x43   :  { %700 = vmatprep.subr.bf16.mxu1 %v852_v0  ;;  %v743_v57 = vpack.c.bf16 %v335_v55, %v334_v54  ;;  %v337_v63 = vand.u32 2147483647, %v91_v60  ;;  %v722_v5 = vpack.c.bf16 %v91_v60, %v90_v59  ;;  %v338_v6 = vand.u32 2147483647, %v92_v3  ;;  %v94_v9 = vld [vmem:[#allocation8 + $0x30] sm:$0xff]  ;;  %v95_v10 = vld [vmem:[#allocation8 + $0x38] sm:$0xff] }
  0x44   :  { %v339_v7 = vand.u32 2147483647, %v93_v4  ;;  %v725_v11 = vpack.c.bf16 %v93_v4, %v92_v3  ;;  %v340_v12 = vand.u32 2147483647, %v94_v9  ;;  %v96_v15 = vld [vmem:[#allocation8 + $0x40] sm:$0xff]  ;;  %v97_v16 = vld [vmem:[#allocation8 + $0x48] sm:$0xff]  ;;  %v728_v17 = vpack.c.bf16 %v95_v10, %v94_v9 }
  0x45   :  { %675 = vmatpush3.bf16.xpose.msra.mxu0 %v674_v13  ;;  %v746_v2 = vpack.c.bf16 %v337_v63, %v336_v62  ;;  %v341_v13 = vand.u32 2147483647, %v95_v10  ;;  %v98_v21 = vld [vmem:[#allocation8 + $0x50] sm:$0xff]  ;;  %v99_v22 = vld [vmem:[#allocation8 + $0x58] sm:$0xff]  ;;  %v731_v23 = vpack.c.bf16 %v97_v16, %v96_v15  ;;  %v100_v27 = vld [vmem:[#allocation8 + $0x60] sm:$0xff]  ;;  %vm855_vm3 = vmmov 1  }
  0x46   :  { %676 = vmatprep.subr.bf16.mxu0 %v852_v0  ;;  %v749_v8 = vpack.c.bf16 %v339_v7, %v338_v6  ;;  %v101_v28 = vld [vmem:[#allocation8 + $0x68] sm:$0xff]  ;;  %v734_v29 = vpack.c.bf16 %v99_v22, %v98_v21  ;;  %v102_v33 = vld [vmem:[#allocation8 + $0x70] sm:$0xff]  ;;  %v103_v34 = vld [vmem:[#allocation8 + $0x78] sm:$0xff] }
  0x47   :  { %v752_v14 = vpack.c.bf16 %v341_v13, %v340_v12  ;;  %v737_v35 = vpack.c.bf16 %v101_v28, %v100_v27  ;;  %v740_v39 = vpack.c.bf16 %v103_v34, %v102_v33  ;;  %v263_v53 = vld [vmem:[#allocation3] sm:$0x1]  ;;  %v432_v59 = vld [vmem:[%s1023_s5] sm:$0x1] }
  0x4a   :  { %702 = vmatpush3.bf16.xpose.msra.mxu1 %v701_v18  ;;  %v342_v18 = vand.u32 2147483647, %v96_v15 }
  0x4b   :  { %703 = vmatprep.subr.bf16.mxu1 %v852_v0 }
  0x4d   :  { %678 = vmatpush3.bf16.xpose.msra.mxu0 %v677_v19  ;;  %v343_v19 = vand.u32 2147483647, %v97_v16 }
  0x4e   :  { %679 = vmatprep.subr.bf16.mxu0 %v852_v0 }
  0x4f   :  { %v755_v20 = vpack.c.bf16 %v343_v19, %v342_v18 }
  0x52   :  { %705 = vmatpush3.bf16.xpose.msra.mxu1 %v704_v24  ;;  %v344_v24 = vand.u32 2147483647, %v98_v21 }
  0x53   :  { %706 = vmatprep.subr.bf16.mxu1 %v852_v0 }
  0x55   :  { %681 = vmatpush3.bf16.xpose.msra.mxu0 %v680_v25  ;;  %v345_v25 = vand.u32 2147483647, %v99_v22 }
  0x56   :  { %682 = vmatprep.subr.bf16.mxu0 %v852_v0 }
  0x57   :  { %v758_v26 = vpack.c.bf16 %v345_v25, %v344_v24 }
  0x5a   :  { %708 = vmatpush3.bf16.xpose.msra.mxu1 %v707_v30  ;;  %v346_v30 = vand.u32 2147483647, %v100_v27 }
  0x5b   :  { %709 = vmatprep.subr.bf16.mxu1 %v852_v0 }
  0x5d   :  { %684 = vmatpush3.bf16.xpose.msra.mxu0 %v683_v31  ;;  %v347_v31 = vand.u32 2147483647, %v101_v28 }
  0x5e   :  { %685 = vmatprep.subr.bf16.mxu0 %v852_v0 }
  0x5f   :  { %v761_v32 = vpack.c.bf16 %v347_v31, %v346_v30 }
  0x62   :  { %711 = vmatpush3.bf16.xpose.msra.mxu1 %v710_v36  ;;  %v348_v36 = vand.u32 2147483647, %v102_v33 }
  0x63   :  { %712 = vmatprep.subr.bf16.mxu1 %v852_v0 }
  0x65   :  { %687 = vmatpush3.bf16.xpose.msra.mxu0 %v686_v37  ;;  %v349_v37 = vand.u32 2147483647, %v103_v34 }
  0x66   :  { %688 = vmatprep.subr.bf16.mxu0 %v852_v0 }
  0x67   :  { %v764_v38 = vpack.c.bf16 %v349_v37, %v348_v36 }
  0x6a   :  { %714 = vmatpush3.bf16.xpose.msra.mxu1 %v713_v42 }
  0x6b   :  { %715 = vmatprep.subr.bf16.mxu1 %v852_v0 }
  0x6d   :  { %690 = vmatpush3.bf16.xpose.msra.mxu0 %v689_v43  ;;  %v104_v43 = vld [vmem:[#allocation2] sm:$0x1] }
  0x6e   :  { %691 = vmatprep.subr.bf16.mxu0 %v852_v0 }
  0x72   :  { %717 = vmatpush3.bf16.xpose.msra.mxu1 %v716_v48 }
  0x73   :  { %742 = vmatprep.subr.bf16.mxu1 %v852_v0 }
  0x75   :  { %693 = vmatpush3.bf16.xpose.msra.mxu0 %v692_v51 }
  0x76   :  { %718 = vmatprep.subr.bf16.mxu0 %v852_v0 }
  0x79   :  { %598 = vmatmul.mubr.f32.vlgmr.msra.gmra.mrb[0].mxu1 %v967_v56 }
  0x7a   :  { %744 = vmatpush3.bf16.xpose.msra.mxu1 %v743_v57  ;;  %667 = vmatprep.mubr.msk.f32.mxu1 %vm854_vm0, %v853_v1 }
  0x7b   :  { %745 = vmatprep.subr.bf16.mxu1 %v852_v0 }
  0x7c   :  { %563 = vmatmul.mubr.f32.vlgmr.msra.gmra.mrb[0].mxu0 %v970_v58 }
  0x7d   :  { %720 = vmatpush3.bf16.xpose.msra.mxu0 %v719_v61  ;;  %632 = vmatprep.mubr.msk.f32.mxu0 %vm854_vm0, %v853_v1 }
  0x7e   :  { %721 = vmatprep.subr.bf16.mxu0 %v852_v0 }
  0x82   :  { %747 = vmatpush3.bf16.xpose.msra.mxu1 %v746_v2 }
  0x83   :  { %748 = vmatprep.subr.bf16.mxu1 %v852_v0 }
  0x85   :  { %723 = vmatpush3.bf16.xpose.msra.mxu0 %v722_v5 }
  0x86   :  { %724 = vmatprep.subr.bf16.mxu0 %v852_v0 }
  0x8a   :  { %750 = vmatpush3.bf16.xpose.msra.mxu1 %v749_v8 }
  0x8b   :  { %751 = vmatprep.subr.bf16.mxu1 %v852_v0 }
  0x8d   :  { %726 = vmatpush3.bf16.xpose.msra.mxu0 %v725_v11 }
  0x8e   :  { %727 = vmatprep.subr.bf16.mxu0 %v852_v0 }
  0x92   :  { %753 = vmatpush3.bf16.xpose.msra.mxu1 %v752_v14 }
  0x93   :  { %754 = vmatprep.subr.bf16.mxu1 %v852_v0 }
  0x95   :  { %729 = vmatpush3.bf16.xpose.msra.mxu0 %v728_v17 }
  0x96   :  { %730 = vmatprep.subr.bf16.mxu0 %v852_v0 }
  0x9a   :  { %756 = vmatpush3.bf16.xpose.msra.mxu1 %v755_v20 }
  0x9b   :  { %757 = vmatprep.subr.bf16.mxu1 %v852_v0 }
  0x9d   :  { %732 = vmatpush3.bf16.xpose.msra.mxu0 %v731_v23 }
  0x9e   :  { %733 = vmatprep.subr.bf16.mxu0 %v852_v0 }
  0xa2   :  { %759 = vmatpush3.bf16.xpose.msra.mxu1 %v758_v26 }
  0xa3   :  { %760 = vmatprep.subr.bf16.mxu1 %v852_v0 }
  0xa5   :  { %735 = vmatpush3.bf16.xpose.msra.mxu0 %v734_v29 }
  0xa6   :  { %736 = vmatprep.subr.bf16.mxu0 %v852_v0 }
  0xaa   :  { %762 = vmatpush3.bf16.xpose.msra.mxu1 %v761_v32 }
  0xab   :  { %763 = vmatprep.subr.bf16.mxu1 %v852_v0 }
  0xad   :  { %738 = vmatpush3.bf16.xpose.msra.mxu0 %v737_v35 }
  0xae   :  { %739 = vmatprep.subr.bf16.mxu0 %v852_v0  ;;  %v428_v0 = vld [vmem:[%s1022_s4] sm:$0x1] }
  0xb2   :  { %765 = vmatpush3.bf16.xpose.msra.mxu1 %v764_v38 }
  0xb5   :  { %741 = vmatpush3.bf16.xpose.msra.mxu0 %v740_v39 }
  0xb9   :  { %668 = vmatmul.mubr.f32.vlgmr.msra.gmra.mrb[2].mxu1 %v970_v58 }
  0xbc   :  { %633 = vmatmul.mubr.f32.vlgmr.msra.gmra.mrb[2].mxu0 %v967_v56 }
 0x14c   :  { %v257_v40 = vpop.f32.mrb[0].mxu1 }
 0x14d   :  { %v599_v41 = vpop.f32.mrb[1].mxu1 }
 0x14f   :  { %v187_v42 = vpop.f32.mrb[0].mxu0 }
 0x150   :  { %v258_v44 = vadd.f32 %v257_v40, %v187_v42  ;;  %v564_v45 = vpop.f32.mrb[1].mxu0 }
 0x152   :  { %v261_v46 = vadd.f32 %v258_v44, %v104_v43 }
 0x154   :  { %262 = vst [vmem:[#allocation2] sm:$0x1] %v261_v46 }
 0x15b   :  { %v426_v47 = vld [vmem:[#allocation2] sm:$0x1] }
 0x15c   :  { %v427_v48 = vmul.f32 0.5, %v426_v47 }
 0x15e   :  { %v429_v49 = vadd.f32 %v428_v0, %v427_v48 }
 0x160   :  { %vm442_vm1 = vcmp.gt.f32.partialorder %v429_v49, 0.0  ;;  %449 = vst [vmem:[%s1024_s6] sm:$0x1] %v429_v49 }
 0x161   :  { %v446_v50 = vsel %vm442_vm1, 1.0, %v853_v1  ;;  %vm444_vm5 = vmxor %vm442_vm1, %vm855_vm3 }
 0x162   :  { %451 = vst [vmem:[%s1024_s6 + $0x2] sm:$0x1] %v446_v50 }
 0x18c   :  { %v416_v51 = vpop.f32.mrb[2].mxu1 }
 0x18d   :  { %v669_v52 = vpop.f32.mrb[3].mxu1 }
 0x18f   :  { %v330_v54 = vpop.f32.mrb[2].mxu0 }
 0x190   :  { %v420_v55 = vsub.f32 %v330_v54, %v416_v51  ;;  %v634_v56 = vpop.f32.mrb[3].mxu0 }
 0x192   :  { %v421_v57 = vadd.f32 %v420_v55, %v263_v53 }
 0x194   :  { %422 = vst [vmem:[#allocation3] sm:$0x1] %v421_v57 }
 0x19b   :  { %v430_v58 = vld [vmem:[#allocation3] sm:$0x1] }
 0x19c   :  { %v431_v60 = vmul.f32 0.5, %v430_v58 }
 0x19e   :  { %v433_v61 = vadd.f32 %v432_v59, %v431_v60 }
 0x1a0   :  { %v434_v1 = vsub.f32 %v433_v61, %v429_v49  ;;  %450 = vst [vmem:[%s1024_s6 + $0x1] sm:$0x1] %v433_v61  ;;  %vm441_vm2 = vcmp.lt.f32.partialorder %v433_v61, 0.0 }
 0x1a1   :  { %vm443_vm4 = vmxor %vm441_vm2, %vm855_vm3 }
 0x1a2   :  { %775 = vrcp.f32 %v434_v1  ;;  %vm445_vm7 = vmand %vm443_vm4, %vm444_vm5 }
 0x1ac   :  { %v776_v62 = vpop.eup %775 }
 0x1ad   :  { %v436_v63 = vmul.f32 %v776_v62, %v433_v61 }
 0x1af   :  { %vm437_vm6 = vcmp.ne.f32.partialorder %v436_v63, %v436_v63 }
 0x1b0   :  { %v438_v2 = vsel %vm437_vm6, 0.0, %v436_v63 }
 0x1b1   :  { %v439_v3 = vsub.f32 1.0, %v438_v2  ;;  %v447_v4 = vsel %vm445_vm7, %v438_v2, %v446_v50 }
 0x1b2   :  { %453 = vst [vmem:[%s1024_s6 + $0x4] sm:$0x1] %v447_v4 }
 0x1b3   :  { %v440_v5 = vmul.f32 %v439_v3, %v433_v61 }
 0x1b5   :  { %v448_v6 = vsel %vm445_vm7, %v440_v5, 0.0 }
 0x1b6   :  { %454 = vst [vmem:[%s1024_s6 + $0x5] sm:$0x1] %v448_v6 }
 0x1b7   :  { %460 = vsyncpa [#allocation5], 1 }
 0x1b8   :  { %461 = vsyncpa [#allocation7], 1 }

</bundles_post_ra>
